<compile_context>
chip_gen: v7x
topology: tpu7x:2x2x1
jax: 0.10.0
libtpu: 0.0.40
codegen_flags: <defaults>
</compile_context>

<pallas_src>
import functools

import jax
import jax.numpy as jnp
from jax.experimental import pallas as pl
from jax.experimental.pallas import tpu as pltpu

N_BINS = 10


# ----------------------------------------------------------------------------
# Kernel 1: streaming global-average-pool (raw sums) over the flattened HW axis.
# ----------------------------------------------------------------------------
def pool_kernel(out_ref, tgt_ref, pooled_fake_ref, pooled_tgt_ref,
                acc_f_ref, acc_t_ref, *, hw, tile_hw, steps_per_core):
    i = pl.program_id(1)                          # step within this core's range
    gstep = pl.program_id(0) * steps_per_core + i
    start = gstep * tile_hw                       # first global lane of this tile

    @pl.when(i == 0)
    def _init():
        acc_f_ref[...] = jnp.zeros_like(acc_f_ref)
        acc_t_ref[...] = jnp.zeros_like(acc_t_ref)

    # Full in-bounds tiles: plain VPU accumulate, co-issues with the DMAs.
    @pl.when(start + tile_hw <= hw)
    def _dense():
        acc_f_ref[...] += out_ref[...].astype(jnp.float32)
        acc_t_ref[...] += tgt_ref[...].astype(jnp.float32)

    # Tail tile (and clamped duplicate steps on the other core): lanes whose
    # global index is >= hw contain undefined data, not zeros -> mask them.
    @pl.when(start + tile_hw > hw)
    def _masked():
        lane = jax.lax.broadcasted_iota(jnp.int32, acc_f_ref.shape, 1)
        valid = (start + lane) < hw
        acc_f_ref[...] += jnp.where(valid, out_ref[...].astype(jnp.float32), 0.0)
        acc_t_ref[...] += jnp.where(valid, tgt_ref[...].astype(jnp.float32), 0.0)

    # Single cross-lane (XLU) reduction once per core, not once per step.
    @pl.when(i == pl.num_programs(1) - 1)
    def _finalize():
        pooled_fake_ref[0, :, :] = jnp.sum(acc_f_ref[...], axis=-1, keepdims=True)
        pooled_tgt_ref[0, :, :] = jnp.sum(acc_t_ref[...], axis=-1, keepdims=True)


# ----------------------------------------------------------------------------
# Kernel 2: tiny aesthetic head + |mean_target - mean_fake| (runs once).
# ----------------------------------------------------------------------------
def head_kernel(fake_ref, tgt_ref, w1_ref, b1_ref, w2_ref, b2_ref, bins_ref,
                res_ref, *, n):
    inv_n = 1.0 / float(n)

    def mean_score(pooled):                        # pooled: (N, C) mean features
        h = jnp.dot(pooled, w1_ref[...],
                    preferred_element_type=jnp.float32) + b1_ref[...]
        h = jnp.maximum(h, 0.0)
        logits = jnp.dot(h, w2_ref[...],
                         preferred_element_type=jnp.float32) + b2_ref[...]
        m = jnp.max(logits, axis=-1, keepdims=True)
        e = jnp.exp(logits - m)
        p = e * pl.reciprocal(jnp.sum(e, axis=-1, keepdims=True), approx=False)
        scores = jnp.sum(p * bins_ref[...], axis=-1, keepdims=True)   # (N, 1)
        return jnp.sum(scores) * inv_n

    res_ref[0, 0] = jnp.abs(mean_score(tgt_ref[...]) - mean_score(fake_ref[...]))


# ----------------------------------------------------------------------------
# Tile selection: byte-targeted, generation-safe.
# ----------------------------------------------------------------------------
def _pick_tile_hw(hw, rows, itemsize, *, block_bytes_target=1 << 20,
                  vmem_budget_bytes=20 << 20):
    """Lane tile (multiple of 128) sized by a per-block byte target.

    A grid step streams 2 images x (rows * tile * itemsize) bytes; ~1 MiB per
    image per buffer keeps the fixed per-step overhead well under 10% even at
    v7x's ~3.2 TB/s HBM.  Clamped so the in-flight footprint
    (2 streams x 2 pipeline buffers x block + 2 f32 accumulators) stays inside a
    conservative VMEM budget (v7x: 64 MiB physical / 32 MiB default-scoped).
    """
    tile = block_bytes_target // max(1, rows * itemsize)
    max_tile = vmem_budget_bytes // max(1, rows * (4 * itemsize + 2 * 4))
    tile = min(tile, max_tile)
    tile = max(128, (tile // 128) * 128)
    hw_pad = -(-hw // 128) * 128                  # never bigger than one image row-block
    return max(128, min(tile, hw_pad))


# ----------------------------------------------------------------------------
# Wrapper: full AestheticLoss forward.
# ----------------------------------------------------------------------------
def aesthetic_loss(out_img, tgt_img, w1, b1, w2, b2, bins, *, tile_hw=None):
    """out_img, tgt_img: (N, C, H, W).  Returns scalar |mean_target - mean_fake|."""
    N, C, H, W = out_img.shape
    HW = H * W
    NC = N * C
    itemsize = jnp.dtype(out_img.dtype).itemsize

    if tile_hw is None:
        tile_hw = _pick_tile_hw(HW, NC, itemsize)
    else:
        tile_hw = max(128, (int(tile_hw) // 128) * 128)   # enforce lane tiling

    nsteps = -(-HW // tile_hw)                    # total lane tiles (no padding)
    steps_per_core = -(-nsteps // 2)              # split across 2 TCs on v7x

    # Free (metadata-only) reshape: dense sublane packing, no jnp.pad copy.
    out2d = out_img.reshape(NC, HW)
    tgt2d = tgt_img.reshape(NC, HW)

    def img_map(c, i):
        # Clamp duplicate/out-of-range steps to the last valid tile; their
        # contribution is fully masked inside the kernel.
        return (0, jnp.minimum(c * steps_per_core + i, nsteps - 1))

    img_spec = pl.BlockSpec((NC, tile_hw), img_map)
    pooled_spec = pl.BlockSpec((1, NC, 1), lambda c, i: (c, 0, 0))

    kernel = functools.partial(pool_kernel, hw=HW, tile_hw=tile_hw,
                               steps_per_core=steps_per_core)

    bytes_streamed = 2 * NC * HW * itemsize
    pooled_f, pooled_t = pl.pallas_call(
        kernel,
        out_shape=(jax.ShapeDtypeStruct((2, NC, 1), jnp.float32),
                   jax.ShapeDtypeStruct((2, NC, 1), jnp.float32)),
        grid=(2, steps_per_core),
        in_specs=[img_spec, img_spec],
        out_specs=(pooled_spec, pooled_spec),
        scratch_shapes=[
            pltpu.VMEM((NC, tile_hw), jnp.float32),   # fake-image running sums
            pltpu.VMEM((NC, tile_hw), jnp.float32),   # target-image running sums
        ],
        compiler_params=pltpu.CompilerParams(
            dimension_semantics=("parallel", "arbitrary"),
            vmem_limit_bytes=32 * 1024 * 1024),
        cost_estimate=pl.CostEstimate(
            flops=2 * 2 * NC * HW,
            transcendentals=0,
            bytes_accessed=bytes_streamed + 2 * 2 * NC * 4),
    )(out2d, tgt2d)

    # Tiny glue (plain JAX): combine the two per-core partial sums, fold the
    # 1/(H*W) mean scale into one multiply, and restore the (N, C) layout.
    inv_hw = 1.0 / float(HW)
    fake_pooled = (jnp.sum(pooled_f, axis=0) * inv_hw).reshape(N, C)
    tgt_pooled = (jnp.sum(pooled_t, axis=0) * inv_hw).reshape(N, C)

    res = pl.pallas_call(
        functools.partial(head_kernel, n=N),
        out_shape=jax.ShapeDtypeStruct((1, 1), jnp.float32),
        in_specs=[pl.BlockSpec(memory_space=pltpu.MemorySpace.VMEM)] * 7,
        out_specs=pl.BlockSpec(memory_space=pltpu.MemorySpace.SMEM),
    )(fake_pooled, tgt_pooled, w1, b1, w2, b2, bins)
    return res[0, 0]


if __name__ == "__main__":
    # Small shapes consistent with the module's forward (NCHW image batches).
    N, C, H, W = 2, 4, 32, 32
    HID = 32

    key = jax.random.PRNGKey(0)
    k_out, k_tgt, k_w1, k_w2 = jax.random.split(key, 4)

    out_img = jax.random.normal(k_out, (N, C, H, W), dtype=jnp.float32)
    tgt_img = jax.random.normal(k_tgt, (N, C, H, W), dtype=jnp.float32)

    # Deterministic synthetic predictor weights (NIMA-style head).
    w1 = jax.random.normal(k_w1, (C, HID), dtype=jnp.float32) * 0.1
    b1 = jnp.zeros((1, HID), dtype=jnp.float32)
    w2 = jax.random.normal(k_w2, (HID, N_BINS), dtype=jnp.float32) * 0.1
    b2 = jnp.zeros((1, N_BINS), dtype=jnp.float32)
    bins = jnp.arange(1, N_BINS + 1, dtype=jnp.float32).reshape(1, N_BINS)

    result = aesthetic_loss(out_img, tgt_img, w1, b1, w2, b2, bins)
    jax.block_until_ready(result)

    # Pure-JAX reference of the same synthetic predictor + loss.
    def ref_loss(o, t):
        def predict(img):
            n, c, h, w = img.shape
            pooled = img.reshape(n, c, h * w).mean(axis=-1)
            hdn = jnp.maximum(pooled @ w1 + b1, 0.0)
            logits = hdn @ w2 + b2
            p = jax.nn.softmax(logits, axis=-1)
            return jnp.mean(jnp.sum(p * bins, axis=-1))
        return jnp.abs(predict(t) - predict(o))

    ref = ref_loss(out_img, tgt_img)
    assert jnp.allclose(result, ref, atol=1e-4), (result, ref)

    # Odd spatial size: exercises the masked (un-padded) tail tile and the
    # fully-masked duplicate step on the second grid-parallel slot.
    H2, W2 = 25, 25
    out2 = jax.random.normal(jax.random.PRNGKey(1), (N, C, H2, W2), jnp.float32)
    tgt2 = jax.random.normal(jax.random.PRNGKey(2), (N, C, H2, W2), jnp.float32)
    result2 = aesthetic_loss(out2, tgt2, w1, b1, w2, b2, bins)
    jax.block_until_ready(result2)
    ref2 = ref_loss(out2, tgt2)
    assert jnp.allclose(result2, ref2, atol=1e-4), (result2, ref2)

    print("KERNEL_OK")
</pallas_src>

<mosaic_0001>
module attributes {stable_mosaic.version = 11 : i64} {
  func.func @pool_kernel(%arg0: i32, %arg1: i32, %arg2: memref<8x1024xf32, #tpu.memory_space<vmem>>, %arg3: memref<8x1024xf32, #tpu.memory_space<vmem>>, %arg4: memref<1x8x1xf32, #tpu.memory_space<vmem>>, %arg5: memref<1x8x1xf32, #tpu.memory_space<vmem>>, %arg6: memref<8x1024xf32, #tpu.memory_space<vmem>>, %arg7: memref<8x1024xf32, #tpu.memory_space<vmem>>) attributes {dimension_semantics = [#tpu.dimension_semantics<parallel>, #tpu.dimension_semantics<arbitrary>], iteration_bounds = array<i64: 2, 1>, scalar_prefetch = 0 : i64, scratch_operands = 2 : i64, tpu.core_type = #tpu.core_type<tc>, window_params = [{transform_indices = @transform_0, window_bounds = array<i64: 8, 1024>}, {transform_indices = @transform_1, window_bounds = array<i64: 8, 1024>}, {transform_indices = @transform_2, window_bounds = array<i64: 1, 8, 1>}, {transform_indices = @transform_3, window_bounds = array<i64: 1, 8, 1>}]} {
    %c1_i32 = arith.constant 1 : i32
    %0 = arith.muli %arg0, %c1_i32 : i32
    %1 = arith.addi %0, %arg1 : i32
    %c1024_i32 = arith.constant 1024 : i32
    %2 = arith.muli %1, %c1024_i32 : i32
    %c0_i32 = arith.constant 0 : i32
    %3 = arith.cmpi eq, %arg1, %c0_i32 : i32
    %4 = arith.extui %3 : i1 to i32
    %c0_i32_0 = arith.constant 0 : i32
    %5 = arith.cmpi ne, %4, %c0_i32_0 : i32
    scf.if %5 {
      %cst = arith.constant 0.000000e+00 : f32
      %17 = vector.broadcast %cst : f32 to vector<8x1024xf32>
      %c0 = arith.constant 0 : index
      %c0_9 = arith.constant 0 : index
      %18 = vector.load %arg6[%c0, %c0_9] : memref<8x1024xf32, #tpu.memory_space<vmem>>, vector<8x1024xf32>
      tpu.vector_store %arg6[%c0, %c0_9], %17 {strides = array<i32>} : memref<8x1024xf32, #tpu.memory_space<vmem>>, vector<8x1024xf32>,
      %cst_10 = arith.constant 0.000000e+00 : f32
      %19 = vector.broadcast %cst_10 : f32 to vector<8x1024xf32>
      %c0_11 = arith.constant 0 : index
      %c0_12 = arith.constant 0 : index
      %20 = vector.load %arg7[%c0_11, %c0_12] : memref<8x1024xf32, #tpu.memory_space<vmem>>, vector<8x1024xf32>
      tpu.vector_store %arg7[%c0_11, %c0_12], %19 {strides = array<i32>} : memref<8x1024xf32, #tpu.memory_space<vmem>>, vector<8x1024xf32>,
    } else {
    }
    %c1024_i32_1 = arith.constant 1024 : i32
    %6 = arith.addi %2, %c1024_i32_1 : i32
    %c1024_i32_2 = arith.constant 1024 : i32
    %7 = arith.cmpi sle, %6, %c1024_i32_2 : i32
    %8 = arith.extui %7 : i1 to i32
    %c0_i32_3 = arith.constant 0 : i32
    %9 = arith.cmpi ne, %8, %c0_i32_3 : i32
    scf.if %9 {
      %c0 = arith.constant 0 : index
      %c0_9 = arith.constant 0 : index
      %17 = vector.load %arg6[%c0, %c0_9] : memref<8x1024xf32, #tpu.memory_space<vmem>>, vector<8x1024xf32>
      %c0_10 = arith.constant 0 : index
      %c0_11 = arith.constant 0 : index
      %18 = vector.load %arg2[%c0_10, %c0_11] : memref<8x1024xf32, #tpu.memory_space<vmem>>, vector<8x1024xf32>
      %19 = arith.addf %17, %18 : vector<8x1024xf32>
      %c0_12 = arith.constant 0 : index
      %c0_13 = arith.constant 0 : index
      %20 = vector.load %arg6[%c0_12, %c0_13] : memref<8x1024xf32, #tpu.memory_space<vmem>>, vector<8x1024xf32>
      tpu.vector_store %arg6[%c0_12, %c0_13], %19 {strides = array<i32>} : memref<8x1024xf32, #tpu.memory_space<vmem>>, vector<8x1024xf32>,
      %c0_14 = arith.constant 0 : index
      %c0_15 = arith.constant 0 : index
      %21 = vector.load %arg7[%c0_14, %c0_15] : memref<8x1024xf32, #tpu.memory_space<vmem>>, vector<8x1024xf32>
      %c0_16 = arith.constant 0 : index
      %c0_17 = arith.constant 0 : index
      %22 = vector.load %arg3[%c0_16, %c0_17] : memref<8x1024xf32, #tpu.memory_space<vmem>>, vector<8x1024xf32>
      %23 = arith.addf %21, %22 : vector<8x1024xf32>
      %c0_18 = arith.constant 0 : index
      %c0_19 = arith.constant 0 : index
      %24 = vector.load %arg7[%c0_18, %c0_19] : memref<8x1024xf32, #tpu.memory_space<vmem>>, vector<8x1024xf32>
      tpu.vector_store %arg7[%c0_18, %c0_19], %23 {strides = array<i32>} : memref<8x1024xf32, #tpu.memory_space<vmem>>, vector<8x1024xf32>,
    } else {
    }
    %c1024_i32_4 = arith.constant 1024 : i32
    %10 = arith.addi %2, %c1024_i32_4 : i32
    %c1024_i32_5 = arith.constant 1024 : i32
    %11 = arith.cmpi sgt, %10, %c1024_i32_5 : i32
    %12 = arith.extui %11 : i1 to i32
    %c0_i32_6 = arith.constant 0 : i32
    %13 = arith.cmpi ne, %12, %c0_i32_6 : i32
    scf.if %13 {
      %17 = tpu.iota {dimensions = array<i32: 1>} : vector<8x1024xi32>
      %18 = vector.broadcast %2 : i32 to vector<8x1024xi32>
      %19 = arith.addi %18, %17 : vector<8x1024xi32>
      %c1024_i32_9 = arith.constant 1024 : i32
      %20 = vector.broadcast %c1024_i32_9 : i32 to vector<8x1024xi32>
      %21 = arith.cmpi slt, %19, %20 : vector<8x1024xi32>
      %c0 = arith.constant 0 : index
      %c0_10 = arith.constant 0 : index
      %22 = vector.load %arg6[%c0, %c0_10] : memref<8x1024xf32, #tpu.memory_space<vmem>>, vector<8x1024xf32>
      %c0_11 = arith.constant 0 : index
      %c0_12 = arith.constant 0 : index
      %23 = vector.load %arg2[%c0_11, %c0_12] : memref<8x1024xf32, #tpu.memory_space<vmem>>, vector<8x1024xf32>
      %cst = arith.constant 0.000000e+00 : f32
      %24 = vector.broadcast %cst : f32 to vector<8x1024xf32>
      %25 = arith.select %21, %23, %24 : vector<8x1024xi1>, vector<8x1024xf32>
      %26 = arith.addf %22, %25 : vector<8x1024xf32>
      %c0_13 = arith.constant 0 : index
      %c0_14 = arith.constant 0 : index
      %27 = vector.load %arg6[%c0_13, %c0_14] : memref<8x1024xf32, #tpu.memory_space<vmem>>, vector<8x1024xf32>
      tpu.vector_store %arg6[%c0_13, %c0_14], %26 {strides = array<i32>} : memref<8x1024xf32, #tpu.memory_space<vmem>>, vector<8x1024xf32>,
      %c0_15 = arith.constant 0 : index
      %c0_16 = arith.constant 0 : index
      %28 = vector.load %arg7[%c0_15, %c0_16] : memref<8x1024xf32, #tpu.memory_space<vmem>>, vector<8x1024xf32>
      %c0_17 = arith.constant 0 : index
      %c0_18 = arith.constant 0 : index
      %29 = vector.load %arg3[%c0_17, %c0_18] : memref<8x1024xf32, #tpu.memory_space<vmem>>, vector<8x1024xf32>
      %cst_19 = arith.constant 0.000000e+00 : f32
      %30 = vector.broadcast %cst_19 : f32 to vector<8x1024xf32>
      %31 = arith.select %21, %29, %30 : vector<8x1024xi1>, vector<8x1024xf32>
      %32 = arith.addf %28, %31 : vector<8x1024xf32>
      %c0_20 = arith.constant 0 : index
      %c0_21 = arith.constant 0 : index
      %33 = vector.load %arg7[%c0_20, %c0_21] : memref<8x1024xf32, #tpu.memory_space<vmem>>, vector<8x1024xf32>
      tpu.vector_store %arg7[%c0_20, %c0_21], %32 {strides = array<i32>} : memref<8x1024xf32, #tpu.memory_space<vmem>>, vector<8x1024xf32>,
    } else {
    }
    %c0_i32_7 = arith.constant 0 : i32
    %14 = arith.cmpi eq, %arg1, %c0_i32_7 : i32
    %15 = arith.extui %14 : i1 to i32
    %c0_i32_8 = arith.constant 0 : i32
    %16 = arith.cmpi ne, %15, %c0_i32_8 : i32
    scf.if %16 {
      %c0 = arith.constant 0 : index
      %c0_9 = arith.constant 0 : index
      %17 = vector.load %arg6[%c0, %c0_9] : memref<8x1024xf32, #tpu.memory_space<vmem>>, vector<8x1024xf32>
      %cst = arith.constant dense<0.000000e+00> : vector<8xf32>
      %18 = vector.multi_reduction <add>, %17, %cst [1] : vector<8x1024xf32> to vector<8xf32>
      %19 = vector.shape_cast %18 : vector<8xf32> to vector<8x1xf32>
      %c0_10 = arith.constant 0 : index
      %c0_11 = arith.constant 0 : index
      %c0_12 = arith.constant 0 : index
      %20 = vector.load %arg4[%c0_10, %c0_11, %c0_12] : memref<1x8x1xf32, #tpu.memory_space<vmem>>, vector<1x8x1xf32>
      %21 = vector.shape_cast %20 : vector<1x8x1xf32> to vector<8x1xf32>
      %22 = vector.shape_cast %19 : vector<8x1xf32> to vector<1x8x1xf32>
      tpu.vector_store %arg4[%c0_10, %c0_11, %c0_12], %22 {strides = array<i32>} : memref<1x8x1xf32, #tpu.memory_space<vmem>>, vector<1x8x1xf32>,
      %c0_13 = arith.constant 0 : index
      %c0_14 = arith.constant 0 : index
      %23 = vector.load %arg7[%c0_13, %c0_14] : memref<8x1024xf32, #tpu.memory_space<vmem>>, vector<8x1024xf32>
      %cst_15 = arith.constant dense<0.000000e+00> : vector<8xf32>
      %24 = vector.multi_reduction <add>, %23, %cst_15 [1] : vector<8x1024xf32> to vector<8xf32>
      %25 = vector.shape_cast %24 : vector<8xf32> to vector<8x1xf32>
      %c0_16 = arith.constant 0 : index
      %c0_17 = arith.constant 0 : index
      %c0_18 = arith.constant 0 : index
      %26 = vector.load %arg5[%c0_16, %c0_17, %c0_18] : memref<1x8x1xf32, #tpu.memory_space<vmem>>, vector<1x8x1xf32>
      %27 = vector.shape_cast %26 : vector<1x8x1xf32> to vector<8x1xf32>
      %28 = vector.shape_cast %25 : vector<8x1xf32> to vector<1x8x1xf32>
      tpu.vector_store %arg5[%c0_16, %c0_17, %c0_18], %28 {strides = array<i32>} : memref<1x8x1xf32, #tpu.memory_space<vmem>>, vector<1x8x1xf32>,
    } else {
    }
    return
  }
  func.func @transform_0(%arg0: i32, %arg1: i32) -> (i32, i32) {
    %c1_i32 = arith.constant 1 : i32
    %0 = arith.muli %arg0, %c1_i32 : i32
    %1 = arith.addi %0, %arg1 : i32
    %c0_i32 = arith.constant 0 : i32
    %2 = arith.minsi %1, %c0_i32 : i32
    %c0_i32_0 = arith.constant 0 : i32
    %c0_i32_1 = arith.constant 0 : i32
    return %c0_i32_0, %2 : i32, i32
  }
  func.func @transform_1(%arg0: i32, %arg1: i32) -> (i32, i32) {
    %c1_i32 = arith.constant 1 : i32
    %0 = arith.muli %arg0, %c1_i32 : i32
    %1 = arith.addi %0, %arg1 : i32
    %c0_i32 = arith.constant 0 : i32
    %2 = arith.minsi %1, %c0_i32 : i32
    %c0_i32_0 = arith.constant 0 : i32
    %c0_i32_1 = arith.constant 0 : i32
    return %c0_i32_0, %2 : i32, i32
  }
  func.func @transform_2(%arg0: i32, %arg1: i32) -> (i32, i32, i32) {
    %c0_i32 = arith.constant 0 : i32
    %c0_i32_0 = arith.constant 0 : i32
    %c0_i32_1 = arith.constant 0 : i32
    return %arg0, %c0_i32, %c0_i32_0 : i32, i32, i32
  }
  func.func @transform_3(%arg0: i32, %arg1: i32) -> (i32, i32, i32) {
    %c0_i32 = arith.constant 0 : i32
    %c0_i32_0 = arith.constant 0 : i32
    %c0_i32_1 = arith.constant 0 : i32
    return %arg0, %c0_i32, %c0_i32_0 : i32, i32, i32
  }
}

</mosaic_0001>

<bundles_post_ra>
// kernel: tpu_custom_call.1
= control target key start
LH: loop header
LB: loop body
LE: loop exit
PB: predicated region body
PF: predicated region fallthrough
CT: control target
= control target key end

     0   :  { %9 = vsyncpa [#allocation5], 0  ;;  %s1079_s0 = inlined_call_operand.hbm [shape: f32[8,1024], index: 0, kind: input, shape index: {}]   ;;  %s1080_s1 = inlined_call_operand.hbm [shape: f32[8,1024], index: 1, kind: input, shape index: {}]   ;;  %s1081_s2 = inlined_call_operand.vmem [shape: f32[2,8,1], index: 2, kind: output, shape index: {0}]   ;;  %s1082_s3 = inlined_call_operand.vmem [shape: f32[2,8,1], index: 3, kind: output, shape index: {1}]  }
   0x1   :  { %11 = vsyncpa [#allocation5 + $0x1], 0 }
   0x2   :  { %12 = vsyncpa [#allocation7], 0 }
   0x3   :  { %14 = vsyncpa [#allocation7 + $0x1], 0  ;;  %s861_s12 = smov 0   ;;  %s863_s13 = smov 0  }
   0x4   :  { %s865_s14 = smov 0   ;;  %s867_s15 = smov 0  }
   0x5   :  { %s869_s16 = smov 0  }
   0x6 LB: > { %s642_s17 = sadd.s32 4294967295, %s836_s16   ;;  %s32_s18 = sadd.s32 1, %s832_s15  ;;  %s836_s16 = sphi %s869_s16, %s20_s16   ;;  %s832_s15 = sphi %s867_s15, %s1093_s15   ;;  %s828_s14 = sphi %s865_s14, %s1092_s14   ;;  %s824_s13 = sphi %s863_s13, %s1069_s13   ;;  %s820_s12 = sphi %s861_s12, %s1091_s12  }
   0x7   : > { %p34_p0 = scmp.ge.s32.totalorder %s32_s18, 2  ;;  %p817_p1 = scmp.ne.s32.totalorder %s824_s13, 0 }
   0x8   : > { %p53_p2 = scmp.eq.s32.totalorder %s836_s16, 0  ;;  %p58_p3 = scmp.ne.s32.totalorder %s824_s13, %s820_s12 }
   0x9   : > { %s1095_s18 = smov (%p34_p0, %s32_s18), 0  ;;  %p59_p4 = scmp.eq.s32.totalorder %s642_s17, 0 }
   0xa   : > { %p54_p5 = por %p817_p1, %p53_p2  ;;  %p675_p7 = scmp.lt.s32.totalorder %s836_s16, 2 }
   0xb   : > { %p891_p6 = por %p59_p4, %p58_p3  ;;  %s838_s20 = smov [#allocation4]  }
   0xc   : > { %s181_s21 = sshll.u32 %s838_s20, 4  ;;  %p896_p8 = pnand %p675_p7, %p54_p5  ;;  %s182_s21 = int_to_ptr.vmem [resolvable:$true] %s181_s21 }
   0xd   : > { %s1084_s19 = scalar_select %p891_p6, 1, 0 }
   0xe   : > { %s725_s25 = scalar_lea.hbm %s1079_s0, 1024  ;;  %p727_p12 = pneg %p896_p8 }
   0xf   : > { %p726_p11 = scmp.ne.s32.totalorder %s1079_s0, %s725_s25  ;;  %p732_p1 = scmp.lt.u32.totalorder %s725_s25, %s725_s25 }
  0x10   : > { %p734_p2 = scmp.lt.u32.totalorder %s725_s25, %s1079_s0 }
  0x11   : > { %p728_p13 = pnand %p727_p12, %p726_p11 }
  0x12   : > { %p735_p3 = por %p734_p2, %p732_p1 }
  0x13   : > { %p729_p0 = pneg %p728_p13 }
  0x15   : > { %p736_p4 = pnand %p735_p3, %p729_p0 }
  0x17   : > { %739 = shalt.err (!%p736_p4)
}
  0x18   : > { %s740_s30 = scalar_lea.vmem %s182_s21, 1024  ;;  %s747_s4 = scalar_lea.vmem %s182_s21, 2048 }
  0x19   : > { %p741_p5 = scmp.ne.s32.totalorder %s182_s21, %s740_s30  ;;  %p748_p10 = scmp.lt.s32.totalorder %s182_s21, %s182_s21 }
  0x1a   : > { %p749_p6 = scmp.lt.s32.totalorder %s747_s4, %s740_s30 }
  0x1b   : > { %p743_p7 = pnand %p741_p5, %p727_p12 }
  0x1c   : > { %p750_p11 = por %p749_p6, %p748_p10 }
  0x1d   : > { %p744_p9 = pneg %p743_p7 }
  0x1f   : > { %p751_p13 = pnand %p750_p11, %p744_p9 }
  0x21   : > { %754 = shalt.err (!%p751_p13)
}
  0x22   : > { %671 = dma.hbm_to_vmem [thread:$0]  (!%p896_p8), %s1079_s0, 1024, %s182_s21, [#allocation5]  }
  0x23   : > { %p1086_p0 = scmp.lt.s32.totalorder %s836_s16, 3  ;;  %p1087_p1 = scmp.ge.s32.totalorder %s836_s16, 1 }
  0x24   : > { %s839_s8 = smov [#allocation6]   ;;  %s755_s12 = scalar_lea.hbm %s1080_s1, 1024 }
  0x25   : > { %p928_p2 = pnand %p1087_p1, %p1086_p0  ;;  %s203_s9 = sshll.u32 %s839_s8, 4  ;;  %s204_s9 = int_to_ptr.vmem [resolvable:$true] %s203_s9 }
  0x26   : > { %p756_p6 = scmp.ne.s32.totalorder %s1080_s1, %s755_s12  ;;  %p762_p3 = scmp.lt.u32.totalorder %s755_s12, %s755_s12 }
  0x27   : > { %s1088_s7 = scalar_select %p928_p2, 1, 0 }
  0x28   : > { %p758_p9 = pnand %p756_p6, %p727_p12  ;;  %p764_p4 = scmp.lt.u32.totalorder %s755_s12, %s1080_s1 }
  0x2a   : > { %p759_p10 = pneg %p758_p9  ;;  %p765_p5 = por %p764_p4, %p762_p3 }
  0x2c   : > { %p766_p7 = pnand %p765_p5, %p759_p10 }
  0x2e   : > { %769 = shalt.err (!%p766_p7)
}
  0x2f   : > { %s770_s24 = scalar_lea.vmem %s204_s9, 1024  ;;  %s777_s25 = scalar_lea.vmem %s204_s9, 2048 }
  0x30   : > { %p771_p11 = scmp.ne.s32.totalorder %s204_s9, %s770_s24  ;;  %p778_p1 = scmp.lt.s32.totalorder %s204_s9, %s204_s9 }
  0x31   : > { %p779_p2 = scmp.lt.s32.totalorder %s777_s25, %s770_s24 }
  0x32   : > { %p773_p13 = pnand %p771_p11, %p727_p12 }
  0x33   : > { %p780_p6 = por %p779_p2, %p778_p1 }
  0x34   : > { %p774_p0 = pneg %p773_p13 }
  0x36   : > { %p781_p9 = pnand %p780_p6, %p774_p0 }
  0x38   : > { %784 = shalt.err (!%p781_p9)
}
  0x39   : > { %674 = dma.hbm_to_vmem [thread:$0]  (!%p896_p8), %s1080_s1, 1024, %s204_s9, [#allocation7]  }
  0x3a   : > { %p1089_p10 = scmp.ne.s32.totalorder %s1088_s7, 0 }
  0x3b   : > { %s214_s28 = sand.u32 (!%p1089_p10), 1, %s824_s13   ;;  %p1090_p12 = scmp.ne.s32.totalorder (!%p1089_p10), %s1084_s19, 0 }
  0x3c   : > { %212 = sbr.rel (%p1089_p10) target bundleno = 276 (0x114), region = 28  ;;  %s653_s29 = sshll.u32 (!%p1089_p10), %s214_s28, 6 }
  0x3d   : > { %s215_s30 = scalar_lea.sflag (!%p1089_p10), [#allocation5], %s214_s28  ;;  %s955_s4 = scalar_lea.vmem (!%p1089_p10), [#allocation4], %s653_s29 }
  0x43   : > { %810 = dma.done.wait (%p1090_p12), %s215_s30, 1024  }
  0x44   : > { %812 = vsyncadd (%p1090_p12), %s215_s30, 4294966272  ;;  %s224_s22 = scalar_lea.sflag [#allocation7], %s214_s28  ;;  %s961_s5 = scalar_lea.vmem [#allocation6], %s653_s29 }
  0x45   : > { %814 = dma.done.wait (%p1090_p12), %s224_s22, 1024  }
  0x46   : > { %816 = vsyncadd (%p1090_p12), %s224_s22, 4294966272  ;;  %p266_p8 = scmp.lt.s32.totalorder %s828_s14, 1  ;;  %s657_s6 = sshll.u32 %s828_s14, 10  ;;  %v840_v0 = vmov 0.0  }
  0x47   : > { %280 = vst [vmem:[#allocation2] sm:$0xff] %v840_v0  ;;  %281 = vst [vmem:[#allocation2 + $0x8] sm:$0xff] %v840_v0  ;;  %s971_s19 = sadd.s32 1024, %s657_s6 }
  0x48   : > { %282 = vst [vmem:[#allocation2 + $0x10] sm:$0xff] %v840_v0  ;;  %283 = vst [vmem:[#allocation2 + $0x18] sm:$0xff] %v840_v0  ;;  %s267_s7 = scalar_select %p266_p8, %s828_s14, 1 }
  0x49   : > { %284 = vst [vmem:[#allocation2 + $0x20] sm:$0xff] %v840_v0  ;;  %285 = vst [vmem:[#allocation2 + $0x28] sm:$0xff] %v840_v0  ;;  %p658_p2 = scmp.gt.s32.totalorder %s971_s19, 1024 }
  0x4a   : > { %286 = vst [vmem:[#allocation2 + $0x30] sm:$0xff] %v840_v0  ;;  %287 = vst [vmem:[#allocation2 + $0x38] sm:$0xff] %v840_v0  ;;  %s655_s8 = sshll.u32 %s267_s7, 3  ;;  %v309_v2 = vld [vmem:[%s955_s4] sm:$0xff] (!%p658_p2)  ;;  %v310_v5 = vld [vmem:[%s955_s4 + $0x8] sm:$0xff] (!%p658_p2) }
  0x4b   : > { %288 = vst [vmem:[#allocation3] sm:$0xff] %v840_v0  ;;  %289 = vst [vmem:[#allocation3 + $0x8] sm:$0xff] %v840_v0  ;;  %s979_s11 = scalar_lea.vmem %s1081_s2, %s655_s8  ;;  %s984_s20 = scalar_lea.vmem %s1082_s3, %s655_s8  ;;  %v311_v7 = vld [vmem:[%s955_s4 + $0x10] sm:$0xff] (!%p658_p2)  ;;  %v312_v11 = vld [vmem:[%s955_s4 + $0x18] sm:$0xff] (!%p658_p2) }
  0x4c   : > { %290 = vst [vmem:[#allocation3 + $0x10] sm:$0xff] %v840_v0  ;;  %291 = vst [vmem:[#allocation3 + $0x18] sm:$0xff] %v840_v0  ;;  %300 = sbr.rel (%p658_p2) target bundleno = 92 (0x5c), region = 44  ;;  %v313_v14 = vld [vmem:[%s955_s4 + $0x20] sm:$0xff] (!%p658_p2)  ;;  %v314_v16 = vld [vmem:[%s955_s4 + $0x28] sm:$0xff] (!%p658_p2) }
  0x4d   : > { %292 = vst [vmem:[#allocation3 + $0x20] sm:$0xff] %v840_v0  ;;  %293 = vst [vmem:[#allocation3 + $0x28] sm:$0xff] %v840_v0  ;;  %v315_v20 = vld [vmem:[%s955_s4 + $0x30] sm:$0xff] (!%p658_p2)  ;;  %v316_v23 = vld [vmem:[%s955_s4 + $0x38] sm:$0xff] (!%p658_p2) }
  0x4e   : > { %294 = vst [vmem:[#allocation3 + $0x30] sm:$0xff] %v840_v0  ;;  %295 = vst [vmem:[#allocation3 + $0x38] sm:$0xff] %v840_v0  ;;  %v301_v1 = vld [vmem:[#allocation2] sm:$0xff] (!%p658_p2)  ;;  %v302_v3 = vld [vmem:[#allocation2 + $0x8] sm:$0xff] (!%p658_p2) }
  0x4f   : > { %v317_v4 = vadd.f32 (!%p658_p2), %v309_v2, %v301_v1  ;;  %v303_v6 = vld [vmem:[#allocation2 + $0x10] sm:$0xff] (!%p658_p2)  ;;  %v318_v8 = vadd.f32 (!%p658_p2), %v310_v5, %v302_v3  ;;  %v304_v10 = vld [vmem:[#allocation2 + $0x18] sm:$0xff] (!%p658_p2)  ;;  %v341_v25 = vld [vmem:[%s961_s5] sm:$0xff] (!%p658_p2) }
  0x50   : > { %v319_v9 = vadd.f32 (!%p658_p2), %v311_v7, %v303_v6  ;;  %v305_v12 = vld [vmem:[#allocation2 + $0x20] sm:$0xff] (!%p658_p2)  ;;  %v320_v13 = vadd.f32 (!%p658_p2), %v312_v11, %v304_v10  ;;  %v306_v15 = vld [vmem:[#allocation2 + $0x28] sm:$0xff] (!%p658_p2)  ;;  %v343_v32 = vld [vmem:[%s961_s5 + $0x10] sm:$0xff] (!%p658_p2) }
  0x51   : > { %325 = vst [vmem:[#allocation2] sm:$0xff] (!%p658_p2), %v317_v4  ;;  %326 = vst [vmem:[#allocation2 + $0x8] sm:$0xff] (!%p658_p2), %v318_v8  ;;  %v321_v17 = vadd.f32 (!%p658_p2), %v313_v14, %v305_v12  ;;  %v322_v18 = vadd.f32 (!%p658_p2), %v314_v16, %v306_v15  ;;  %v307_v19 = vld [vmem:[#allocation2 + $0x30] sm:$0xff] (!%p658_p2)  ;;  %v308_v21 = vld [vmem:[#allocation2 + $0x38] sm:$0xff] (!%p658_p2) }
  0x52   : > { %327 = vst [vmem:[#allocation2 + $0x10] sm:$0xff] (!%p658_p2), %v319_v9  ;;  %328 = vst [vmem:[#allocation2 + $0x18] sm:$0xff] (!%p658_p2), %v320_v13  ;;  %v323_v22 = vadd.f32 (!%p658_p2), %v315_v20, %v307_v19  ;;  %v333_v24 = vld [vmem:[#allocation3] sm:$0xff] (!%p658_p2)  ;;  %v324_v26 = vadd.f32 (!%p658_p2), %v316_v23, %v308_v21  ;;  %v334_v28 = vld [vmem:[#allocation3 + $0x8] sm:$0xff] (!%p658_p2) }
  0x53   : > { %329 = vst [vmem:[#allocation2 + $0x20] sm:$0xff] %v321_v17  ;;  %330 = vst [vmem:[#allocation2 + $0x28] sm:$0xff] %v322_v18  ;;  %v349_v27 = vadd.f32 %v341_v25, %v333_v24  ;;  %v342_v29 = vld [vmem:[%s961_s5 + $0x8] sm:$0xff]  ;;  %v335_v30 = vld [vmem:[#allocation3 + $0x10] sm:$0xff] }
  0x54   : > { %331 = vst [vmem:[#allocation2 + $0x30] sm:$0xff] %v323_v22  ;;  %v350_v31 = vadd.f32 %v342_v29, %v334_v28  ;;  %v336_v33 = vld [vmem:[#allocation3 + $0x18] sm:$0xff]  ;;  %332 = vst [vmem:[#allocation2 + $0x38] sm:$0xff] %v324_v26  ;;  %v351_v35 = vadd.f32 %v343_v32, %v335_v30  ;;  %v337_v37 = vld [vmem:[#allocation3 + $0x20] sm:$0xff] }
  0x55   : > { %v344_v34 = vld [vmem:[%s961_s5 + $0x18] sm:$0xff]  ;;  %357 = vst [vmem:[#allocation3] sm:$0xff] %v349_v27  ;;  %v345_v38 = vld [vmem:[%s961_s5 + $0x20] sm:$0xff]  ;;  %v338_v39 = vld [vmem:[#allocation3 + $0x28] sm:$0xff] }
  0x56   : > { %v352_v36 = vadd.f32 %v344_v34, %v336_v33  ;;  %358 = vst [vmem:[#allocation3 + $0x8] sm:$0xff] %v350_v31  ;;  %v353_v40 = vadd.f32 %v345_v38, %v337_v37  ;;  %v346_v41 = vld [vmem:[%s961_s5 + $0x28] sm:$0xff]  ;;  %v339_v42 = vld [vmem:[#allocation3 + $0x30] sm:$0xff]  ;;  %359 = vst [vmem:[#allocation3 + $0x10] sm:$0xff] %v351_v35 }
  0x57   : > { %v347_v43 = vld [vmem:[%s961_s5 + $0x30] sm:$0xff]  ;;  %v354_v44 = vadd.f32 %v346_v41, %v338_v39  ;;  %v340_v46 = vld [vmem:[#allocation3 + $0x38] sm:$0xff] }
  0x58   : > { %360 = vst [vmem:[#allocation3 + $0x18] sm:$0xff] %v352_v36  ;;  %v355_v45 = vadd.f32 %v347_v43, %v339_v42  ;;  %v348_v47 = vld [vmem:[%s961_s5 + $0x38] sm:$0xff]  ;;  %361 = vst [vmem:[#allocation3 + $0x20] sm:$0xff] %v353_v40 }
  0x59   : > { %v356_v48 = vadd.f32 %v348_v47, %v340_v46  ;;  %362 = vst [vmem:[#allocation3 + $0x28] sm:$0xff] %v354_v44 }
  0x5a   : > { %363 = vst [vmem:[#allocation3 + $0x30] sm:$0xff] %v355_v45 }
  0x5b   : > { %364 = vst [vmem:[#allocation3 + $0x38] sm:$0xff] %v356_v48 }
  0x5c PF: > { %p659_p3 = scmp.le.s32.totalorder %s971_s19, 1024 }
  0x5d   : > { %v369_v49 = vlaneseq (!%p659_p3)  ;;  %v378_v50 = vstv (!%p659_p3), %s657_s6  ;;  %v403_v54 = vld [vmem:[%s955_s4] sm:$0xff] (!%p659_p3)  ;;  %v404_v59 = vld [vmem:[%s955_s4 + $0x8] sm:$0xff] (!%p659_p3)  ;;  %v405_v3 = vld [vmem:[%s955_s4 + $0x10] sm:$0xff] (!%p659_p3) }
  0x5e   : > { %368 = sbr.rel (%p659_p3) target bundleno = 114 (0x72), region = 48  ;;  %v406_v5 = vld [vmem:[%s955_s4 + $0x18] sm:$0xff] (!%p659_p3)  ;;  %v407_v10 = vld [vmem:[%s955_s4 + $0x20] sm:$0xff] (!%p659_p3)  ;;  %v408_v15 = vld [vmem:[%s955_s4 + $0x28] sm:$0xff] (!%p659_p3) }
  0x5f   : > { %v370_v51 = vand.u32 (!%p659_p3), 127, %v369_v49  ;;  %v401_v16 = vld [vmem:[#allocation2 + $0x30] sm:$0xff] (!%p659_p3)  ;;  %v410_v21 = vld [vmem:[%s955_s4 + $0x38] sm:$0xff] (!%p659_p3)  ;;  %v443_v22 = vld [vmem:[%s961_s5] sm:$0xff] (!%p659_p3) }
  0x60   : > { %v409_v17 = vld [vmem:[%s955_s4 + $0x30] sm:$0xff] (!%p659_p3)  ;;  %v444_v23 = vld [vmem:[%s961_s5 + $0x8] sm:$0xff] (!%p659_p3)  ;;  %v402_v28 = vld [vmem:[#allocation2 + $0x38] sm:$0xff] (!%p659_p3) }
  0x61   : > { %v1006_v52 = vadd.s32 (!%p659_p3), %v378_v50, %v370_v51  ;;  %v395_v53 = vld [vmem:[#allocation2] sm:$0xff] (!%p659_p3)  ;;  %v371_v55 = vadd.s32 (!%p659_p3), 128, %v370_v51  ;;  %v372_v56 = vadd.s32 (!%p659_p3), 256, %v370_v51  ;;  %v373_v57 = vadd.s32 (!%p659_p3), 384, %v370_v51  ;;  %v396_v58 = vld [vmem:[#allocation2 + $0x8] sm:$0xff] (!%p659_p3)  ;;  %v437_v31 = vld [vmem:[#allocation3 + $0x10] sm:$0xff] (!%p659_p3) }
  0x62   : > { %v374_v60 = vadd.s32 (!%p659_p3), 512, %v370_v51  ;;  %v375_v61 = vadd.s32 (!%p659_p3), 640, %v370_v51  ;;  %v376_v62 = vadd.s32 (!%p659_p3), 768, %v370_v51  ;;  %v377_v63 = vadd.s32 (!%p659_p3), 896, %v370_v51  ;;  %v397_v2 = vld [vmem:[#allocation2 + $0x10] sm:$0xff] (!%p659_p3)  ;;  %v398_v7 = vld [vmem:[#allocation2 + $0x18] sm:$0xff] (!%p659_p3) }
  0x63   : > { %vm387_vm0 = vcmp.lt.s32.totalorder (!%p659_p3), %v1006_v52, 1024  ;;  %v380_v0 = vadd.s32 (!%p659_p3), %v378_v50, %v371_v55  ;;  %v1011_v1 = vadd.s32 (!%p659_p3), %v378_v50, %v372_v56  ;;  %v382_v4 = vadd.s32 (!%p659_p3), %v378_v50, %v373_v57  ;;  %v399_v9 = vld [vmem:[#allocation2 + $0x20] sm:$0xff] (!%p659_p3)  ;;  %v400_v14 = vld [vmem:[#allocation2 + $0x28] sm:$0xff] (!%p659_p3)  ;;  %v445_v34 = vld [vmem:[%s961_s5 + $0x10] sm:$0xff] (!%p659_p3) }
  0x64   : > { %v411_v6 = vsel (!%p659_p3), %vm387_vm0, %v403_v54, 0.0  ;;  %v1017_v8 = vadd.s32 (!%p659_p3), %v378_v50, %v374_v60  ;;  %v1020_v11 = vadd.s32 (!%p659_p3), %v378_v50, %v375_v61  ;;  %v1022_v12 = vadd.s32 (!%p659_p3), %v378_v50, %v376_v62  ;;  %v435_v29 = vld [vmem:[#allocation3] sm:$0xff] (!%p659_p3)  ;;  %v436_v30 = vld [vmem:[#allocation3 + $0x8] sm:$0xff] (!%p659_p3)  ;;  %v438_v35 = vld [vmem:[#allocation3 + $0x18] sm:$0xff] (!%p659_p3) }
  0x65   : > { %v419_v13 = vadd.f32 %v411_v6, %v395_v53  ;;  %vm388_vm1 = vcmp.lt.s32.totalorder %v380_v0, 1024  ;;  %vm389_vm2 = vcmp.lt.s32.totalorder %v1011_v1, 1024  ;;  %vm390_vm3 = vcmp.lt.s32.totalorder %v382_v4, 1024  ;;  %v446_v36 = vld [vmem:[%s961_s5 + $0x18] sm:$0xff]  ;;  %v439_v41 = vld [vmem:[#allocation3 + $0x20] sm:$0xff]  ;;  %v448_v46 = vld [vmem:[%s961_s5 + $0x28] sm:$0xff] }
  0x66   : > { %v412_v18 = vsel %vm388_vm1, %v404_v59, 0.0  ;;  %v413_v19 = vsel %vm389_vm2, %v405_v3, 0.0  ;;  %v414_v20 = vsel %vm390_vm3, %v406_v5, 0.0  ;;  %vm391_vm4 = vcmp.lt.s32.totalorder %v1017_v8, 1024  ;;  %v447_v42 = vld [vmem:[%s961_s5 + $0x20] sm:$0xff]  ;;  %v449_v47 = vld [vmem:[%s961_s5 + $0x30] sm:$0xff] }
  0x67   : > { %427 = vst [vmem:[#allocation2] sm:$0xff] %v419_v13  ;;  %v420_v24 = vadd.f32 %v412_v18, %v396_v58  ;;  %v421_v25 = vadd.f32 %v413_v19, %v397_v2  ;;  %v422_v26 = vadd.f32 %v414_v20, %v398_v7  ;;  %v415_v27 = vsel %vm391_vm4, %v407_v10, 0.0  ;;  %v450_v48 = vld [vmem:[%s961_s5 + $0x38] sm:$0xff]  ;;  %v440_v53 = vld [vmem:[#allocation3 + $0x28] sm:$0xff]  ;;  %v441_v54 = vld [vmem:[#allocation3 + $0x30] sm:$0xff] }
  0x68   : > { %v423_v32 = vadd.f32 %v415_v27, %v399_v9  ;;  %vm392_vm5 = vcmp.lt.s32.totalorder %v1020_v11, 1024  ;;  %vm393_vm6 = vcmp.lt.s32.totalorder %v1022_v12, 1024  ;;  %v386_v33 = vadd.s32 %v378_v50, %v377_v63  ;;  %v442_v55 = vld [vmem:[#allocation3 + $0x38] sm:$0xff] }
  0x69   : > { %428 = vst [vmem:[#allocation2 + $0x8] sm:$0xff] %v420_v24  ;;  %429 = vst [vmem:[#allocation2 + $0x10] sm:$0xff] %v421_v25  ;;  %v416_v37 = vsel %vm392_vm5, %v408_v15, 0.0  ;;  %v417_v38 = vsel %vm393_vm6, %v409_v17, 0.0  ;;  %v451_v39 = vsel %vm387_vm0, %v443_v22, 0.0  ;;  %v452_v40 = vsel %vm388_vm1, %v444_v23, 0.0 }
  0x6a   : > { %430 = vst [vmem:[#allocation2 + $0x18] sm:$0xff] %v422_v26  ;;  %431 = vst [vmem:[#allocation2 + $0x20] sm:$0xff] %v423_v32  ;;  %v424_v43 = vadd.f32 %v416_v37, %v400_v14  ;;  %v425_v44 = vadd.f32 %v417_v38, %v401_v16  ;;  %vm394_vm7 = vcmp.lt.s32.totalorder %v386_v33, 1024  ;;  %v459_v45 = vadd.f32 %v451_v39, %v435_v29 }
  0x6b   : > { %v418_v49 = vsel %vm394_vm7, %v410_v21, 0.0  ;;  %v460_v50 = vadd.f32 %v452_v40, %v436_v30  ;;  %v453_v51 = vsel %vm389_vm2, %v445_v34, 0.0  ;;  %v454_v52 = vsel %vm390_vm3, %v446_v36, 0.0 }
  0x6c   : > { %432 = vst [vmem:[#allocation2 + $0x28] sm:$0xff] %v424_v43  ;;  %433 = vst [vmem:[#allocation2 + $0x30] sm:$0xff] %v425_v44  ;;  %v426_v56 = vadd.f32 %v418_v49, %v402_v28  ;;  %v461_v57 = vadd.f32 %v453_v51, %v437_v31  ;;  %v462_v58 = vadd.f32 %v454_v52, %v438_v35  ;;  %v455_v59 = vsel %vm391_vm4, %v447_v42, 0.0 }
  0x6d   : > { %467 = vst [vmem:[#allocation3] sm:$0xff] %v459_v45  ;;  %468 = vst [vmem:[#allocation3 + $0x8] sm:$0xff] %v460_v50  ;;  %v463_v60 = vadd.f32 %v455_v59, %v439_v41  ;;  %v456_v61 = vsel %vm392_vm5, %v448_v46, 0.0  ;;  %v457_v62 = vsel %vm393_vm6, %v449_v47, 0.0  ;;  %v458_v63 = vsel %vm394_vm7, %v450_v48, 0.0 }
  0x6e   : > { %434 = vst [vmem:[#allocation2 + $0x38] sm:$0xff] %v426_v56  ;;  %469 = vst [vmem:[#allocation3 + $0x10] sm:$0xff] %v461_v57  ;;  %v464_v0 = vadd.f32 %v456_v61, %v440_v53  ;;  %v465_v1 = vadd.f32 %v457_v62, %v441_v54  ;;  %v466_v2 = vadd.f32 %v458_v63, %v442_v55 }
  0x6f   : > { %470 = vst [vmem:[#allocation3 + $0x18] sm:$0xff] %v462_v58  ;;  %471 = vst [vmem:[#allocation3 + $0x20] sm:$0xff] %v463_v60 }
  0x70   : > { %472 = vst [vmem:[#allocation3 + $0x28] sm:$0xff] %v464_v0  ;;  %473 = vst [vmem:[#allocation3 + $0x30] sm:$0xff] %v465_v1 }
  0x71   : > { %474 = vst [vmem:[#allocation3 + $0x38] sm:$0xff] %v466_v2 }
  0x72 PF: > { %v478_v3 = vld [vmem:[#allocation2] sm:$0xff]  ;;  %v479_v4 = vld [vmem:[#allocation2 + $0x8] sm:$0xff]  ;;  %v480_v5 = vld [vmem:[#allocation2 + $0x10] sm:$0xff]  ;;  %vm495_vm8 = vcmask 7168  }
  0x73   : > { %v486_v6 = vadd.f32 %v479_v4, %v478_v3  ;;  %v481_v7 = vld [vmem:[#allocation2 + $0x18] sm:$0xff]  ;;  %v482_v12 = vld [vmem:[#allocation2 + $0x20] sm:$0xff]  ;;  %v483_v16 = vld [vmem:[#allocation2 + $0x28] sm:$0xff] }
  0x74   : > { %v497_v8 = vld [vmem:[#allocation3] sm:$0xff]  ;;  %v498_v10 = vld [vmem:[#allocation3 + $0x8] sm:$0xff]  ;;  %v484_v20 = vld [vmem:[#allocation2 + $0x30] sm:$0xff] }
  0x75   : > { %v487_v9 = vadd.f32 %v486_v6, %v480_v5  ;;  %v499_v11 = vld [vmem:[#allocation3 + $0x10] sm:$0xff]  ;;  %v505_v13 = vadd.f32 %v498_v10, %v497_v8  ;;  %v485_v24 = vld [vmem:[#allocation2 + $0x38] sm:$0xff] }
  0x76   : > { %v500_v15 = vld [vmem:[#allocation3 + $0x18] sm:$0xff]  ;;  %v501_v19 = vld [vmem:[#allocation3 + $0x20] sm:$0xff] }
  0x77   : > { %v488_v14 = vadd.f32 %v487_v9, %v481_v7  ;;  %v506_v17 = vadd.f32 %v505_v13, %v499_v11  ;;  %v502_v23 = vld [vmem:[#allocation3 + $0x28] sm:$0xff]  ;;  %v503_v27 = vld [vmem:[#allocation3 + $0x30] sm:$0xff] }
  0x78   : > { %v504_v30 = vld [vmem:[#allocation3 + $0x38] sm:$0xff] }
  0x79   : > { %v489_v18 = vadd.f32 %v488_v14, %v482_v12  ;;  %v507_v21 = vadd.f32 %v506_v17, %v500_v15 }
  0x7b   : > { %v490_v22 = vadd.f32 %v489_v18, %v483_v16  ;;  %v508_v25 = vadd.f32 %v507_v21, %v501_v19 }
  0x7d   : > { %v491_v26 = vadd.f32 %v490_v22, %v484_v20  ;;  %v509_v28 = vadd.f32 %v508_v25, %v502_v23 }
  0x7f   : > { %v492_v29 = vadd.f32 %v491_v26, %v485_v24  ;;  %v510_v31 = vadd.f32 %v509_v28, %v503_v27 }
  0x81   : > { %493 = vadd.xlane.f32.xlu0 %v492_v29  ;;  %v511_v32 = vadd.f32 %v510_v31, %v504_v30 }
  0x85   : > { %512 = vadd.xlane.f32.xlu0 %v511_v32 }
 0x10e   : > { %v494_v33 = vpop.xlane.xlu0 %493 }
 0x10f   : > { %496 = vst.msk [vmem:[%s979_s11] sm:$0xff] %vm495_vm8, %v494_v33 }
 0x112   : > { %v513_v34 = vpop.xlane.xlu0 %512 }
 0x113   : > { %514 = vst.msk [vmem:[%s984_s20] sm:$0xff] %vm495_vm8, %v513_v34 }
 0x114 PF: > { %s20_s16 = sadd.s32 1, %s836_s16   ;;  %s1091_s12 = smov %s824_s13 }
 0x115   : > { %p17_p4 = scmp.ge.s32.totalorder %s20_s16, 4   ;;  %s1069_s13 = smov 0  }
 0x116   : > { %s1092_s14 = smov %s832_s15  ;;  %s1093_s15 = smov %s1095_s18 }
 0x117   :  { %19 = sbr.rel (!%p17_p4) target bundleno = 6 (0x6), region = 109 }
 0x11e   :  { %548 = vsyncpa [#allocation5], 1 }
 0x11f   :  { %550 = vsyncpa [#allocation5 + $0x1], 1 }
 0x120   :  { %551 = vsyncpa [#allocation7], 1 }
 0x121   :  { %553 = vsyncpa [#allocation7 + $0x1], 1 }

</bundles_post_ra>
